<compile_context>
chip_gen: v7x
topology: tpu7x:2x2x1
jax: 0.10.0
libtpu: 0.0.40
codegen_flags: <defaults>
</compile_context>

<pallas_src>
import functools

import jax
import jax.numpy as jnp
from jax.experimental import pallas as pl
from jax.experimental.pallas import tpu as pltpu


def _round_up(x, m):
    return ((x + m - 1) // m) * m


def _pick_tile(n, target, align):
    """Tile size <= ~target: full (8-padded) dim if small, else a balanced
    tile (aligned to `align`) that keeps padding waste minimal."""
    n8 = _round_up(n, 8)
    if n8 <= target:
        return n8
    ntiles = -(-n // target)
    return _round_up(-(-n // ntiles), align)


def _vmem_limit_bytes():
    """Per-generation scoped-VMEM budget (3/4 of physical), safe fallback."""
    try:
        info = pltpu.get_tpu_info()
        cap = getattr(info, "vmem_capacity_bytes", None)
        if cap:
            return int(cap) * 3 // 4
    except Exception:
        pass
    return 48 * 1024 * 1024  # conservative: fits v7x's 64 MiB physical VMEM


# ---------------------------------------------------------------------------
# Kernels
# ---------------------------------------------------------------------------

def _gcn_az_resident_kernel(a_ref, z_ref, b_ref, o_ref, acc_ref, *, tk):
    """acc += A_tile @ Z[k-slice]; Z = x @ W^T is fully VMEM-resident."""
    k = pl.program_id(1)

    @pl.when(k == 0)
    def _():
        acc_ref[...] = jnp.zeros_like(acc_ref)

    off = pl.multiple_of(k * tk, tk)
    a = a_ref[...].astype(z_ref.dtype)          # per-tile cast (VPU), no HBM pass
    acc_ref[...] += jnp.dot(a, z_ref[pl.ds(off, tk), :],
                            preferred_element_type=jnp.float32)

    @pl.when(k == pl.num_programs(1) - 1)
    def _():
        y = acc_ref[...] + b_ref[...]
        o_ref[...] = jnp.maximum(y, 0.0).astype(o_ref.dtype)


def _gcn_az_stream_kernel(a_ref, z_ref, b_ref, o_ref, acc_ref):
    """acc += A_tile @ Z_tile; Z streamed per K tile (large-N fallback)."""
    k = pl.program_id(1)

    @pl.when(k == 0)
    def _():
        acc_ref[...] = jnp.zeros_like(acc_ref)

    acc_ref[...] += jnp.dot(a_ref[...].astype(z_ref.dtype), z_ref[...],
                            preferred_element_type=jnp.float32)

    @pl.when(k == pl.num_programs(1) - 1)
    def _():
        y = acc_ref[...] + b_ref[...]
        o_ref[...] = jnp.maximum(y, 0.0).astype(o_ref.dtype)


def _gcn_axw_kernel(a_ref, x_ref, w_ref, b_ref, o_ref, acc_ref):
    """acc += A_tile @ x_tile; finalize with an f32 projection (W stays f32)."""
    k = pl.program_id(1)

    @pl.when(k == 0)
    def _():
        acc_ref[...] = jnp.zeros_like(acc_ref)

    acc_ref[...] += jnp.dot(a_ref[...].astype(x_ref.dtype), x_ref[...],
                            preferred_element_type=jnp.float32)

    @pl.when(k == pl.num_programs(1) - 1)
    def _():
        # Small, off the K-loop critical path: keep full f32 precision.
        y = jnp.dot(acc_ref[...], w_ref[...], preferred_element_type=jnp.float32)
        o_ref[...] = jnp.maximum(y + b_ref[...], 0.0).astype(o_ref.dtype)


# ---------------------------------------------------------------------------
# Wrapper
# ---------------------------------------------------------------------------

def gcn_layer(a_hat, x, weight, bias, *, compute_dtype=jnp.bfloat16,
              tm=None, tk=None):
    """relu((a_hat @ x) @ weight.T + bias).

    a_hat: [N, N], x: [N, F_in], weight: [F_out, F_in] (nn.Linear convention),
    bias: [F_out].  Returns [N, F_out] in x.dtype.
    """
    n, f_in = x.shape
    f_out = weight.shape[0]
    out_dtype = x.dtype

    f_in_p = _round_up(f_in, 128)
    f_out_p = _round_up(f_out, 128)   # lane-dense output stores
    # Pre-fold x @ W^T whenever it does not widen the streamed lane width.
    fold = f_out_p <= f_in_p

    if tm is None:
        tm = _pick_tile(n, 512, 8)
    if tk is None:
        tk = _pick_tile(n, 1024, 128)
    n_m = -(-n // tm)
    n_k = -(-n // tk)
    n_rows, n_cols = n_m * tm, n_k * tk
    grid = (n_m, n_k)

    # A_hat: stream untouched when no padding is required (kernel casts each
    # tile); otherwise materialize one padded bf16/compute-dtype copy.
    if n_rows == n and n_cols == n:
        a_in = a_hat
    else:
        a_in = jnp.pad(a_hat,
                       ((0, n_rows - n), (0, n_cols - n))).astype(compute_dtype)

    b_p = jnp.pad(bias.astype(jnp.float32), (0, f_out_p - f_out)).reshape(1, f_out_p)

    vmem_limit = _vmem_limit_bytes()
    compiler_params = pltpu.CompilerParams(
        dimension_semantics=("parallel", "arbitrary"),
        vmem_limit_bytes=int(vmem_limit))

    a_bytes = a_in.size * a_in.dtype.itemsize
    out_hbm_bytes = n_rows * f_out_p * jnp.dtype(out_dtype).itemsize

    if fold:
        # Z = x @ W^T (tiny), computed once in f32, stored in compute dtype.
        z = jnp.dot(x.astype(jnp.float32), weight.astype(jnp.float32).T)
        z_p = jnp.pad(z, ((0, n_cols - n), (0, f_out_p - f_out))).astype(compute_dtype)
        z_bytes = z_p.size * z_p.dtype.itemsize

        # Keep Z fully VMEM-resident (fetched exactly once) when it fits.
        vmem_need = (2 * z_bytes                                   # Z buffers
                     + 2 * tm * tk * a_in.dtype.itemsize           # A double-buffer
                     + tm * f_out_p * 4                            # f32 accumulator
                     + 2 * tm * f_out_p * jnp.dtype(out_dtype).itemsize)
        resident = vmem_need <= int(0.8 * vmem_limit)

        if resident:
            kernel = functools.partial(_gcn_az_resident_kernel, tk=tk)
            z_spec = pl.BlockSpec((n_cols, f_out_p), lambda i, k: (0, 0))
            z_traffic = z_bytes
        else:
            kernel = _gcn_az_stream_kernel
            z_spec = pl.BlockSpec((tk, f_out_p), lambda i, k: (k, 0))
            z_traffic = z_bytes * n_m   # re-streamed once per row tile

        cost = pl.CostEstimate(
            flops=2 * n_rows * n_cols * f_out_p, transcendentals=0,
            bytes_accessed=int(a_bytes + z_traffic + b_p.size * 4 + out_hbm_bytes))

        out = pl.pallas_call(
            kernel,
            out_shape=jax.ShapeDtypeStruct((n_rows, f_out_p), out_dtype),
            grid=grid,
            in_specs=[
                pl.BlockSpec((tm, tk), lambda i, k: (i, k)),
                z_spec,
                pl.BlockSpec((1, f_out_p), lambda i, k: (0, 0)),
            ],
            out_specs=pl.BlockSpec((tm, f_out_p), lambda i, k: (i, 0)),
            scratch_shapes=[pltpu.VMEM((tm, f_out_p), jnp.float32)],
            compiler_params=compiler_params,
            cost_estimate=cost,
        )(a_in, z_p, b_p)
    else:
        x_p = jnp.pad(x, ((0, n_cols - n), (0, 0))).astype(compute_dtype)
        # W^T stays f32: the finalize projection runs in full precision.
        w_p = jnp.pad(weight.astype(jnp.float32).T, ((0, 0), (0, f_out_p - f_out)))
        cost = pl.CostEstimate(
            flops=2 * n_rows * n_cols * f_in + 2 * n_rows * f_in * f_out_p,
            transcendentals=0,
            bytes_accessed=int(a_bytes
                               + x_p.size * x_p.dtype.itemsize * n_m
                               + w_p.size * 4 + b_p.size * 4 + out_hbm_bytes))

        out = pl.pallas_call(
            _gcn_axw_kernel,
            out_shape=jax.ShapeDtypeStruct((n_rows, f_out_p), out_dtype),
            grid=grid,
            in_specs=[
                pl.BlockSpec((tm, tk), lambda i, k: (i, k)),
                pl.BlockSpec((tk, f_in), lambda i, k: (k, 0)),
                pl.BlockSpec((f_in, f_out_p), lambda i, k: (0, 0)),
                pl.BlockSpec((1, f_out_p), lambda i, k: (0, 0)),
            ],
            out_specs=pl.BlockSpec((tm, f_out_p), lambda i, k: (i, 0)),
            scratch_shapes=[pltpu.VMEM((tm, f_in), jnp.float32)],
            compiler_params=compiler_params,
            cost_estimate=cost,
        )(a_in, x_p, w_p, b_p)

    return out[:n, :f_out]


# ---------------------------------------------------------------------------
# Self-test
# ---------------------------------------------------------------------------

if __name__ == "__main__":
    def make_inputs(key, n, f_in, f_out):
        k_a, k_x, k_w, k_b = jax.random.split(key, 4)
        a_raw = jax.random.uniform(k_a, (n, n), dtype=jnp.float32)
        a_hat = a_raw / jnp.sum(a_raw, axis=-1, keepdims=True)  # row-normalized adjacency
        x = jax.random.normal(k_x, (n, f_in), dtype=jnp.float32)
        bound = 1.0 / (f_in ** 0.5)
        weight = jax.random.uniform(k_w, (f_out, f_in), minval=-bound,
                                    maxval=bound, dtype=jnp.float32)
        bias = jax.random.uniform(k_b, (f_out,), minval=-bound, maxval=bound,
                                  dtype=jnp.float32)
        return a_hat, x, weight, bias

    def reference(a_hat, x, weight, bias):
        return jnp.maximum(jnp.dot(jnp.dot(a_hat, x), weight.T) + bias, 0.0)

    # 1) Toy GCNLayer shape from the spec: 8 nodes, 16 -> 32 features (f32).
    a_hat, x, weight, bias = make_inputs(jax.random.PRNGKey(0), 8, 16, 32)
    out = gcn_layer(a_hat, x, weight, bias, compute_dtype=jnp.float32)
    jax.block_until_ready(out)
    assert out.shape == (8, 32)
    assert jnp.allclose(out, reference(a_hat, x, weight, bias), atol=1e-2, rtol=1e-2)

    # 2) Larger graph: multi-row-tile grid, unpadded A streamed in f32 and
    #    cast to bf16 in-kernel, Z resident in VMEM.
    a2, x2, w2, b2 = make_inputs(jax.random.PRNGKey(1), 640, 16, 32)
    out2 = gcn_layer(a2, x2, w2, b2)  # default bf16 compute, f32 accumulation
    jax.block_until_ready(out2)
    assert out2.shape == (640, 32)
    assert jnp.allclose(out2, reference(a2, x2, w2, b2), atol=3e-2, rtol=3e-2)

    # 3) F_out < F_in: still the pre-folded (A @ (x W^T)) path.
    a3, x3, w3, b3 = make_inputs(jax.random.PRNGKey(2), 64, 32, 16)
    out3 = gcn_layer(a3, x3, w3, b3, compute_dtype=jnp.float32)
    jax.block_until_ready(out3)
    assert out3.shape == (64, 16)
    assert jnp.allclose(out3, reference(a3, x3, w3, b3), atol=1e-2, rtol=1e-2)

    # 4) Wide output (f_out_p > f_in_p): axw path with f32 finalize, plus a
    #    ragged N that exercises the padded-A fallback.
    a4, x4, w4, b4 = make_inputs(jax.random.PRNGKey(3), 100, 64, 192)
    out4 = gcn_layer(a4, x4, w4, b4, compute_dtype=jnp.float32)
    jax.block_until_ready(out4)
    assert out4.shape == (100, 192)
    assert jnp.allclose(out4, reference(a4, x4, w4, b4), atol=1e-2, rtol=1e-2)

    print("KERNEL_OK")
</pallas_src>

<mosaic_0001>
module attributes {stable_mosaic.version = 11 : i64} {
  func.func @_gcn_az_resident_kernel(%arg0: i32, %arg1: i32, %arg2: memref<8x8xf32, #tpu.memory_space<vmem>>, %arg3: memref<8x128xf32, #tpu.memory_space<vmem>>, %arg4: memref<1x128xf32, #tpu.memory_space<vmem>>, %arg5: memref<8x128xf32, #tpu.memory_space<vmem>>, %arg6: memref<8x128xf32, #tpu.memory_space<vmem>>) attributes {dimension_semantics = [#tpu.dimension_semantics<parallel>, #tpu.dimension_semantics<arbitrary>], iteration_bounds = array<i64: 1, 1>, scalar_prefetch = 0 : i64, scratch_operands = 1 : i64, tpu.core_type = #tpu.core_type<tc>, window_params = [{transform_indices = @transform_0, window_bounds = array<i64: 8, 8>}, {pipeline_mode = #tpu.pipeline_mode<synchronous>, transform_indices = @transform_1, window_bounds = array<i64: 8, 128>}, {pipeline_mode = #tpu.pipeline_mode<synchronous>, transform_indices = @transform_2, window_bounds = array<i64: 1, 128>}, {transform_indices = @transform_3, window_bounds = array<i64: 8, 128>}]} {
    %c0_i32 = arith.constant 0 : i32
    %0 = arith.cmpi eq, %arg1, %c0_i32 : i32
    %1 = arith.extui %0 : i1 to i32
    %c0_i32_0 = arith.constant 0 : i32
    %2 = arith.cmpi ne, %1, %c0_i32_0 : i32
    scf.if %2 {
      %cst_9 = arith.constant 0.000000e+00 : f32
      %15 = vector.broadcast %cst_9 : f32 to vector<8x128xf32>
      %c0_10 = arith.constant 0 : index
      %c0_11 = arith.constant 0 : index
      %16 = vector.load %arg6[%c0_10, %c0_11] : memref<8x128xf32, #tpu.memory_space<vmem>>, vector<8x128xf32>
      tpu.vector_store %arg6[%c0_10, %c0_11], %15 {strides = array<i32>} : memref<8x128xf32, #tpu.memory_space<vmem>>, vector<8x128xf32>,
    } else {
    }
    %c8_i32 = arith.constant 8 : i32
    %3 = arith.muli %arg1, %c8_i32 : i32
    %4 = tpu.assume_multiple %3, 8 : i32
    %c0 = arith.constant 0 : index
    %c0_1 = arith.constant 0 : index
    %5 = vector.load %arg2[%c0, %c0_1] : memref<8x8xf32, #tpu.memory_space<vmem>>, vector<8x8xf32>
    %c0_2 = arith.constant 0 : index
    %c0_3 = arith.constant 0 : index
    %6 = vector.load %arg6[%c0_2, %c0_3] : memref<8x128xf32, #tpu.memory_space<vmem>>, vector<8x128xf32>
    %7 = arith.index_cast %4 : i32 to index
    %c0_4 = arith.constant 0 : index
    %8 = vector.load %arg3[%7, %c0_4] : memref<8x128xf32, #tpu.memory_space<vmem>>, vector<8x128xf32>
    %cst = arith.constant dense<0.000000e+00> : vector<8x128xf32>
    %9 = tpu.matmul %5, %8, %cst {dimension_numbers = #tpu.dot_dimension_numbers<[1], [0], [0], [1], [0, 0, 1, 1], [], []>} : vector<8x8xf32>, vector<8x128xf32>, vector<8x128xf32> -> vector<8x128xf32>
    %10 = arith.addf %6, %9 : vector<8x128xf32>
    %c0_5 = arith.constant 0 : index
    %c0_6 = arith.constant 0 : index
    %11 = vector.load %arg6[%c0_5, %c0_6] : memref<8x128xf32, #tpu.memory_space<vmem>>, vector<8x128xf32>
    tpu.vector_store %arg6[%c0_5, %c0_6], %10 {strides = array<i32>} : memref<8x128xf32, #tpu.memory_space<vmem>>, vector<8x128xf32>,
    %c0_i32_7 = arith.constant 0 : i32
    %12 = arith.cmpi eq, %arg1, %c0_i32_7 : i32
    %13 = arith.extui %12 : i1 to i32
    %c0_i32_8 = arith.constant 0 : i32
    %14 = arith.cmpi ne, %13, %c0_i32_8 : i32
    scf.if %14 {
      %c0_9 = arith.constant 0 : index
      %c0_10 = arith.constant 0 : index
      %15 = vector.load %arg6[%c0_9, %c0_10] : memref<8x128xf32, #tpu.memory_space<vmem>>, vector<8x128xf32>
      %c0_11 = arith.constant 0 : index
      %c0_12 = arith.constant 0 : index
      %16 = vector.load %arg4[%c0_11, %c0_12] : memref<1x128xf32, #tpu.memory_space<vmem>>, vector<1x128xf32>
      %17 = vector.broadcast %16 : vector<1x128xf32> to vector<8x128xf32>
      %18 = arith.addf %15, %17 : vector<8x128xf32>
      %cst_13 = arith.constant 0.000000e+00 : f32
      %19 = vector.broadcast %cst_13 : f32 to vector<8x128xf32>
      %20 = arith.maximumf %18, %19 : vector<8x128xf32>
      %c0_14 = arith.constant 0 : index
      %c0_15 = arith.constant 0 : index
      %21 = vector.load %arg5[%c0_14, %c0_15] : memref<8x128xf32, #tpu.memory_space<vmem>>, vector<8x128xf32>
      tpu.vector_store %arg5[%c0_14, %c0_15], %20 {strides = array<i32>} : memref<8x128xf32, #tpu.memory_space<vmem>>, vector<8x128xf32>,
    } else {
    }
    return
  }
  func.func @transform_0(%arg0: i32, %arg1: i32) -> (i32, i32) {
    %c0_i32 = arith.constant 0 : i32
    return %arg0, %arg1 : i32, i32
  }
  func.func @transform_1(%arg0: i32, %arg1: i32) -> (i32, i32) {
    %c0_i32 = arith.constant 0 : i32
    %c0_i32_0 = arith.constant 0 : i32
    %c0_i32_1 = arith.constant 0 : i32
    return %c0_i32, %c0_i32_0 : i32, i32
  }
  func.func @transform_2(%arg0: i32, %arg1: i32) -> (i32, i32) {
    %c0_i32 = arith.constant 0 : i32
    %c0_i32_0 = arith.constant 0 : i32
    %c0_i32_1 = arith.constant 0 : i32
    return %c0_i32, %c0_i32_0 : i32, i32
  }
  func.func @transform_3(%arg0: i32, %arg1: i32) -> (i32, i32) {
    %c0_i32 = arith.constant 0 : i32
    %c0_i32_0 = arith.constant 0 : i32
    return %arg0, %c0_i32 : i32, i32
  }
}

</mosaic_0001>

<bundles_post_ra>
// kernel: tpu_custom_call.1
= control target key start
LH: loop header
LB: loop body
LE: loop exit
PB: predicated region body
PF: predicated region fallthrough
CT: control target
= control target key end

     0   :  { %8 = vsyncpa [#allocation4], 0  ;;  %s305_s0 = inlined_call_operand.hbm [shape: f32[8,8], index: 0, kind: input, shape index: {}]   ;;  %s306_s1 = inlined_call_operand.hbm [shape: f32[8,128], index: 1, kind: input, shape index: {}]   ;;  %s307_s2 = inlined_call_operand.vmem [shape: f32[1,128], index: 2, kind: input, shape index: {}]   ;;  %s308_s3 = inlined_call_operand.hbm [shape: f32[8,128], index: 3, kind: output, shape index: {}]  }
   0x1   :  { %9 = vsyncpa [#allocation7], 0 }
   0x2   :  { %10 = vsyncpa [#allocation5], 0  ;;  %s241_s12 = smov [#allocation3]   ;;  %s242_s14 = smov [#allocation6]  }
   0x3   :  { %s17_s13 = sshll.u32 %s241_s12, 4  ;;  %s27_s15 = sshll.u32 %s242_s14, 4  ;;  %s18_s13 = int_to_ptr.vmem [resolvable:$true] %s17_s13  ;;  %s28_s15 = int_to_ptr.vmem [resolvable:$true] %s27_s15 }
   0x4   :  { %s169_s18 = scalar_lea.hbm %s305_s0, 128 }
   0x5   :  { %p170_p0 = scmp.ne.s32.totalorder %s305_s0, %s169_s18  ;;  %p173_p1 = scmp.lt.u32.totalorder %s169_s18, %s305_s0 }
   0x7   :  { %p175_p2 = pnand %p173_p1, %p170_p0 }
   0x9   :  { %178 = shalt.err (!%p175_p2)
}
   0xa   :  { %s179_s23 = scalar_lea.vmem %s18_s13, 128  ;;  %p184_p4 = scmp.lt.s32.totalorder %s18_s13, %s18_s13 }
   0xb   :  { %p180_p3 = scmp.ne.s32.totalorder %s18_s13, %s179_s23  ;;  %p185_p5 = scmp.lt.s32.totalorder %s179_s23, %s179_s23 }
   0xd   :  { %p186_p6 = por %p185_p5, %p184_p4 }
   0xf   :  { %p187_p7 = pnand %p186_p6, %p180_p3 }
  0x11   :  { %190 = shalt.err (!%p187_p7)
}
  0x12   :  { %20 = dma.hbm_to_vmem [thread:$0]  %s305_s0, 128, %s18_s13, [#allocation4]  }
  0x13   :  { %s191_s28 = scalar_lea.hbm %s306_s1, 128 }
  0x14   :  { %p192_p8 = scmp.ne.s32.totalorder %s306_s1, %s191_s28  ;;  %p195_p9 = scmp.lt.u32.totalorder %s191_s28, %s306_s1 }
  0x16   :  { %p197_p10 = pnand %p195_p9, %p192_p8 }
  0x18   :  { %200 = shalt.err (!%p197_p10)
}
  0x19   :  { %s201_s6 = scalar_lea.vmem %s28_s15, 128  ;;  %p206_p12 = scmp.lt.s32.totalorder %s28_s15, %s28_s15 }
  0x1a   :  { %p202_p11 = scmp.ne.s32.totalorder %s28_s15, %s201_s6  ;;  %p207_p13 = scmp.lt.s32.totalorder %s201_s6, %s201_s6 }
  0x1c   :  { %p208_p0 = por %p207_p13, %p206_p12 }
  0x1e   :  { %p209_p1 = pnand %p208_p0, %p202_p11 }
  0x20   :  { %212 = shalt.err (!%p209_p1)
}
  0x21   :  { %30 = dma.hbm_to_vmem [thread:$0]  %s306_s1, 128, %s28_s15, [#allocation7]  }
  0x22   :  { %235 = dma.done.wait [#allocation4], 128  }
  0x23   :  { %236 = vsyncadd [#allocation4], 4294967168 }
  0x24   :  { %237 = dma.done.wait [#allocation7], 128  }
  0x25   :  { %238 = vsyncadd [#allocation7], 4294967168  ;;  %v243_v0 = vmov 0.0   ;;  %vm244_vm0 = vmmov 0   ;;  %vm49_vm1 = vcmask 64512   ;;  %v48_v1 = vld [vmem:[#allocation6] sm:$0xff] }
  0x26   :  { %159 = vmatprep.subr.mxu0 %v243_v0  ;;  %161 = vmatprep.mubr.msk.f32.mxu0 %vm244_vm0, %v243_v0  ;;  %v45_v2 = vld [vmem:[#allocation3] sm:$0xff]  ;;  %s245_s10 = smov [#allocation8]  }
  0x27   :  { %160 = vmatpush3.msra.mxu0 %v48_v1  ;;  %v156_v3 = vld [vmem:[%s307_s2] ss:$0 sm:$0xff]  ;;  %s145_s1 = sshll.u32 %s245_s10, 4  ;;  %s146_s1 = int_to_ptr.vmem [resolvable:$true] %s145_s1 }
  0x28   :  { %162 = vmatmul.mubr.msk.f32.vlgmr.msra.gmra.mrb[0].mxu0 %vm49_vm1, %v45_v2  ;;  %s213_s11 = scalar_lea.vmem %s146_s1, 128  ;;  %p218_p3 = scmp.lt.s32.totalorder %s146_s1, %s146_s1 }
  0x29   :  { %p214_p2 = scmp.ne.s32.totalorder %s146_s1, %s213_s11  ;;  %p219_p4 = scmp.lt.s32.totalorder %s213_s11, %s213_s11 }
  0x2b   :  { %p220_p5 = por %p219_p4, %p218_p3 }
  0x2d   :  { %p221_p6 = pnand %p220_p5, %p214_p2 }
  0xfb   :  { %v119_v4 = vpop.f32.mrb[0].mxu0 }
  0xfc   :  { %v136_v5 = vadd.f32 %v156_v3, %v119_v4  ;;  %v163_v6 = vpop.f32.mrb[1].mxu0 }
  0xfe   :  { %v137_v7 = vmax.f32 %v136_v5, 0.0 }
 0x100   :  { %138 = vst [vmem:[#allocation8] sm:$0xff] %v137_v7 }
 0x101   :  { %224 = shalt.err (!%p221_p6)
}
 0x102   :  { %s225_s14 = scalar_lea.hbm %s308_s3, 128 }
 0x103   :  { %p226_p7 = scmp.ne.s32.totalorder %s308_s3, %s225_s14  ;;  %p229_p8 = scmp.lt.u32.totalorder %s225_s14, %s308_s3 }
 0x105   :  { %p231_p9 = pnand %p229_p8, %p226_p7 }
 0x107   :  { %234 = shalt.err (!%p231_p9)
}
 0x108   :  { %148 = dma.vmem_to_hbm [thread:$0]  %s146_s1, 128, %s308_s3, [#allocation5]  }
 0x109   :  { %239 = dma.done.wait [#allocation5], 128  }
 0x10a   :  { %240 = vsyncadd [#allocation5], 4294967168 }
 0x10b   :  { %152 = vsyncpa [#allocation4], 1 }
 0x10c   :  { %153 = vsyncpa [#allocation7], 1 }
 0x10d   :  { %154 = vsyncpa [#allocation5], 1 }

</bundles_post_ra>
